<compile_context>
chip_gen: v7x
topology: tpu7x:2x2x1
jax: 0.10.0
libtpu: 0.0.40
codegen_flags: <defaults>
</compile_context>

<pallas_src>
import functools

import numpy as np
import jax
import jax.numpy as jnp
from jax.experimental import pallas as pl
from jax.experimental.pallas import tpu as pltpu

LANES = 128  # TPU vreg lane width; all weight/output lane dims are padded to this.


def kimnet_kernel(emb_ref, w_ref, bias_ref, out_ref, *, b, l, fw, lw, kc):
    """Fused conv + max-pool + fc1 + fc2 + all task heads.

    emb_ref : (B*L, D)          bf16  flattened word embeddings
    w_ref   : (kc + 3*128, 128) bf16  packed weights [conv(kc) | fc1 | fc2 | heads]
    bias_ref: (4, 128)          f32   rows = [bc, b1, b2, bh_cat]
    out_ref : (B, 128)          f32   concatenated task logits (lane-dense store)
    """
    fpad = out_ref.shape[-1]
    d = emb_ref.shape[1]

    bc = bias_ref[0:1, :]
    b1 = bias_ref[1:2, :]
    b2 = bias_ref[2:3, :]
    bh = bias_ref[3:4, :]

    # Packed weight slab; all row offsets are multiples of 16 (bf16 tile rows).
    wc = w_ref[0:kc, :]                            # (fw*D, 128) conv
    w1 = w_ref[kc:kc + LANES, :]                   # (128, 128)  fc1 (zero-padded)
    w2 = w_ref[kc + LANES:kc + 2 * LANES, :]       # (128, 128)  fc2 (zero-padded)
    wh = w_ref[kc + 2 * LANES:kc + 3 * LANES, :]   # (128, 128)  heads (lane-concat)

    # --- Conv1d(1, F, fw*D, stride=D) as a single K=fw*D matmul (1 MXU push
    # instead of fw).  lhs row r = [emb[r], emb[r+1], ..., emb[r+fw-1]] on
    # lanes; taps are sublane-shifted copies of the ~2 KB operand (f32 path so
    # unaligned sublane slices avoid packed-dtype relayouts).  Rows whose
    # windows run past a sentence end (j >= lw) are garbage and masked below.
    emb32 = emb_ref[...].astype(jnp.float32)                       # (B*L, D) f32
    taps = [emb32]
    for p in range(1, fw):
        taps.append(jnp.concatenate(
            [emb32[p:, :], jnp.zeros((p, d), jnp.float32)], axis=0))
    lhs = jnp.concatenate(taps, axis=1).astype(jnp.bfloat16)       # (B*L, fw*D)

    s2d = jnp.dot(lhs, wc, preferred_element_type=jnp.float32)     # (B*L, 128) f32

    # bias + ReLU + tail-window mask (tiny (1, L, 1) iota, not a full (B, L,
    # 128) int32 iota), then max-pool over the L window positions.  ReLU >= 0
    # makes the zeroed invalid windows max-neutral.
    s = (s2d + bc).reshape(b, l, fpad)
    row_ok = jax.lax.broadcasted_iota(jnp.int32, (1, l, 1), 1) < lw
    feat = jnp.max(jnp.where(row_ok, jnp.maximum(s, 0.0), 0.0), axis=1)  # (B, 128)

    # fc1 / fc2 (+ReLU). drop1/drop2 are identity at inference time.
    h = jnp.maximum(
        jnp.dot(feat.astype(jnp.bfloat16), w1,
                preferred_element_type=jnp.float32) + b1, 0.0)
    h = jnp.maximum(
        jnp.dot(h.astype(jnp.bfloat16), w2,
                preferred_element_type=jnp.float32) + b2, 0.0)

    # All task heads fused into one lane-dense matmul + one unmasked store.
    out_ref[...] = jnp.dot(h.astype(jnp.bfloat16), wh,
                           preferred_element_type=jnp.float32) + bh


def _pad2d(a, rows, cols):
    return jnp.pad(a, ((0, rows - a.shape[0]), (0, cols - a.shape[1])))


def prepare_params(wc, bc, w1, b1, w2, b2, wh, bh, *, fw, word_dim):
    """One-time prep: lane-pad to 128, concat heads, pack weights & biases."""
    T, nhid, N = wh.shape
    kc = fw * word_dim                              # conv contraction length
    assert kc % 16 == 0, "conv weight slab must stay bf16 sublane-tile aligned"

    wh_cat = jnp.transpose(wh, (1, 0, 2)).reshape(nhid, T * N)     # (nhid, T*N)
    bh_cat = jnp.transpose(bh, (1, 0, 2)).reshape(1, T * N)

    # Single packed bf16 weight buffer: [conv | fc1 | fc2 | heads].
    weights = jnp.concatenate([
        _pad2d(wc, kc, LANES),
        _pad2d(w1, LANES, LANES),
        _pad2d(w2, LANES, LANES),
        _pad2d(wh_cat, LANES, LANES),
    ], axis=0).astype(jnp.bfloat16)                 # (kc + 3*128, 128)

    biases = jnp.concatenate([
        _pad2d(bc, 1, LANES),
        _pad2d(b1, 1, LANES),
        _pad2d(b2, 1, LANES),
        _pad2d(bh_cat, 1, LANES),
    ], axis=0).astype(jnp.float32)                  # (4, 128)

    meta = dict(T=T, N=N, kc=kc)
    return weights, biases, meta


def kimnet_forward(emb, weights, biases, *, fw, T, N, kc):
    """emb: (B, L, D) embeddings (bf16 preferred). Returns (T, B, N) logits."""
    B, L, D = emb.shape
    assert L % 8 == 0, "L must be a multiple of 8 for the (B, L, 128) reshape"
    lw = L - fw + 1

    emb2d = emb.reshape(B * L, D).astype(jnp.bfloat16)  # no-op if already bf16

    vmem = pl.BlockSpec(memory_space=pltpu.MemorySpace.VMEM)
    kernel = functools.partial(kimnet_kernel, b=B, l=L, fw=fw, lw=lw, kc=kc)

    # No grid: the whole problem fits one invocation at these sizes (wall time
    # is launch + serial MXU latency).  If B is ever scaled up, add a leading
    # batch grid axis with dimension_semantics=("parallel", ...) so both v7x
    # TensorCores get work, keep the output block lane-dense, and size the
    # batch tile for VMEM (Bt*L <= ~2048 on v7x's 64 MiB, ~2x that on v6e, and
    # raise vmem_limit_bytes above the 16/32 MiB scoped defaults on v5e/v6e).
    logits = pl.pallas_call(
        kernel,
        out_shape=jax.ShapeDtypeStruct((B, LANES), jnp.float32),
        in_specs=[vmem] * 3,
        out_specs=vmem,
    )(emb2d, weights, biases)

    # First T*N lanes hold the concatenated task heads; split back to (T, B, N).
    return jnp.transpose(logits[:, :T * N].reshape(B, T, N), (1, 0, 2))


def kimnet_apply(x, emb_table, weights, biases, *, fw, T, N, kc):
    """Token ids -> logits.  Gather + kernel + unpack fused under one jit."""
    emb = emb_table[x]                               # (B, L, D) bf16 gather
    return kimnet_forward(emb, weights, biases, fw=fw, T=T, N=N, kc=kc)


if __name__ == "__main__":
    key = jax.random.PRNGKey(0)

    # Module config (small, consistent with the forward pass):
    B = 2                  # batch
    L = 16                 # MAX_SENT_LEN (width)
    D = 16                 # WORD_DIM   (height)
    voc_size = 50
    F = 8                  # args.filter_num
    filters = 1            # args.filters (fc1 in-dim == filters * filter_num)
    nhid = 32
    taskcla = [(0, 5), (1, 5)]
    FW = 3                 # FILTERS[0]
    T, N = len(taskcla), taskcla[0][1]

    ks = jax.random.split(key, 10)
    # bf16 frozen embedding table -> the gather emits bf16 directly.
    emb_table = (jax.random.normal(ks[0], (voc_size, D), jnp.float32) * 0.1
                 ).astype(jnp.bfloat16)
    wc = jax.random.normal(ks[1], (FW * D, F), jnp.float32) * 0.1   # conv (kernel, out_ch)
    bc = jax.random.normal(ks[2], (1, F), jnp.float32) * 0.1
    w1 = jax.random.normal(ks[3], (filters * F, nhid), jnp.float32) * 0.1
    b1 = jax.random.normal(ks[4], (1, nhid), jnp.float32) * 0.1
    w2 = jax.random.normal(ks[5], (nhid, nhid), jnp.float32) * 0.1
    b2 = jax.random.normal(ks[6], (1, nhid), jnp.float32) * 0.1
    wh = jax.random.normal(ks[7], (T, nhid, N), jnp.float32) * 0.1
    bh = jax.random.normal(ks[8], (T, 1, N), jnp.float32) * 0.1

    x = jax.random.randint(ks[9], (B, L), 0, voc_size)

    weights, biases, meta = prepare_params(wc, bc, w1, b1, w2, b2, wh, bh,
                                           fw=FW, word_dim=D)
    fwd = jax.jit(functools.partial(kimnet_apply, fw=FW, T=meta["T"],
                                    N=meta["N"], kc=meta["kc"]))
    out = jax.block_until_ready(fwd(x, emb_table, weights, biases))

    # Pure-JAX reference of the same forward (bf16 matmul operands, f32
    # accumulation) built with explicit im2col windows.
    emb = emb_table[x]                                               # (B, L, D) bf16
    Lw = L - FW + 1
    cast = lambda a: a.astype(jnp.bfloat16)
    hwin = jnp.stack(
        [emb[:, p:p + FW, :].reshape(B, FW * D) for p in range(Lw)], axis=1)
    s = jnp.einsum('blk,kf->blf', cast(hwin), cast(wc),
                   preferred_element_type=jnp.float32) + bc
    feat = jnp.max(jnp.maximum(s, 0.0), axis=1)
    h = jnp.maximum(jnp.dot(cast(feat), cast(w1),
                            preferred_element_type=jnp.float32) + b1, 0.0)
    h = jnp.maximum(jnp.dot(cast(h), cast(w2),
                            preferred_element_type=jnp.float32) + b2, 0.0)
    ref = jnp.stack(
        [jnp.dot(cast(h), cast(wh[t]), preferred_element_type=jnp.float32) + bh[t]
         for t in range(T)], axis=0)

    assert out.shape == (T, B, N)
    assert np.allclose(np.asarray(out), np.asarray(ref), atol=5e-3, rtol=5e-3)

    # TODO(synk): fc3 is defined in __init__ but never used in forward(), and
    # drop1/drop2 are identity at inference, so neither is implemented; the
    # frozen-embedding gather stays as (jit-fused) XLA glue rather than Pallas.
    print("KERNEL_OK")
</pallas_src>

<mosaic_0001>
module attributes {stable_mosaic.version = 11 : i64} {
  func.func @kimnet_kernel(%arg0: memref<32x16xbf16, #tpu.memory_space<vmem>>, %arg1: memref<432x128xbf16, #tpu.memory_space<vmem>>, %arg2: memref<4x128xf32, #tpu.memory_space<vmem>>, %arg3: memref<2x128xf32, #tpu.memory_space<vmem>>) attributes {dimension_semantics = [], scalar_prefetch = 0 : i64, scratch_operands = 0 : i64, tpu.core_type = #tpu.core_type<tc>} {
    %c0 = arith.constant 0 : index
    %c0_0 = arith.constant 0 : index
    %0 = vector.load %arg2[%c0, %c0_0] : memref<4x128xf32, #tpu.memory_space<vmem>>, vector<1x128xf32>
    %c1 = arith.constant 1 : index
    %c0_1 = arith.constant 0 : index
    %1 = vector.load %arg2[%c1, %c0_1] : memref<4x128xf32, #tpu.memory_space<vmem>>, vector<1x128xf32>
    %c2 = arith.constant 2 : index
    %c0_2 = arith.constant 0 : index
    %2 = vector.load %arg2[%c2, %c0_2] : memref<4x128xf32, #tpu.memory_space<vmem>>, vector<1x128xf32>
    %c3 = arith.constant 3 : index
    %c0_3 = arith.constant 0 : index
    %3 = vector.load %arg2[%c3, %c0_3] : memref<4x128xf32, #tpu.memory_space<vmem>>, vector<1x128xf32>
    %c0_4 = arith.constant 0 : index
    %c0_5 = arith.constant 0 : index
    %4 = vector.load %arg1[%c0_4, %c0_5] : memref<432x128xbf16, #tpu.memory_space<vmem>>, vector<48x128xbf16>
    %c48 = arith.constant 48 : index
    %c0_6 = arith.constant 0 : index
    %5 = vector.load %arg1[%c48, %c0_6] : memref<432x128xbf16, #tpu.memory_space<vmem>>, vector<128x128xbf16>
    %c176 = arith.constant 176 : index
    %c0_7 = arith.constant 0 : index
    %6 = vector.load %arg1[%c176, %c0_7] : memref<432x128xbf16, #tpu.memory_space<vmem>>, vector<128x128xbf16>
    %c304 = arith.constant 304 : index
    %c0_8 = arith.constant 0 : index
    %7 = vector.load %arg1[%c304, %c0_8] : memref<432x128xbf16, #tpu.memory_space<vmem>>, vector<128x128xbf16>
    %c0_9 = arith.constant 0 : index
    %c0_10 = arith.constant 0 : index
    %8 = vector.load %arg0[%c0_9, %c0_10] : memref<32x16xbf16, #tpu.memory_space<vmem>>, vector<32x16xbf16>
    %9 = arith.extf %8 : vector<32x16xbf16> to vector<32x16xf32>
    %10 = vector.extract_strided_slice %9 {offsets = [1, 0], sizes = [31, 16], strides = [1, 1]} : vector<32x16xf32> to vector<31x16xf32>
    %cst = arith.constant 0.000000e+00 : f32
    %11 = vector.broadcast %cst : f32 to vector<1x16xf32>
    %12 = tpu.concatenate %10, %11 in 0 : vector<31x16xf32>, vector<1x16xf32> -> vector<32x16xf32>
    %13 = vector.extract_strided_slice %9 {offsets = [2, 0], sizes = [30, 16], strides = [1, 1]} : vector<32x16xf32> to vector<30x16xf32>
    %cst_11 = arith.constant 0.000000e+00 : f32
    %14 = vector.broadcast %cst_11 : f32 to vector<2x16xf32>
    %15 = tpu.concatenate %13, %14 in 0 : vector<30x16xf32>, vector<2x16xf32> -> vector<32x16xf32>
    %16 = tpu.concatenate %9, %12, %15 in 1 : vector<32x16xf32>, vector<32x16xf32>, vector<32x16xf32> -> vector<32x48xf32>
    %17 = arith.truncf %16 : vector<32x48xf32> to vector<32x48xbf16>
    %cst_12 = arith.constant dense<0.000000e+00> : vector<32x128xf32>
    %18 = tpu.matmul %17, %4, %cst_12 {dimension_numbers = #tpu.dot_dimension_numbers<[1], [0], [0], [1], [0, 0, 1, 1], [], []>} : vector<32x48xbf16>, vector<48x128xbf16>, vector<32x128xf32> -> vector<32x128xf32>
    %19 = vector.broadcast %0 : vector<1x128xf32> to vector<32x128xf32>
    %20 = arith.addf %18, %19 : vector<32x128xf32>
    %21 = vector.shape_cast %20 : vector<32x128xf32> to vector<2x16x128xf32>
    %22 = tpu.iota {dimensions = array<i32: 1>} : vector<1x16x1xi32>
    %c14_i32 = arith.constant 14 : i32
    %23 = vector.broadcast %c14_i32 : i32 to vector<1x16x1xi32>
    %24 = arith.cmpi slt, %22, %23 : vector<1x16x1xi32>
    %cst_13 = arith.constant 0.000000e+00 : f32
    %25 = vector.broadcast %cst_13 : f32 to vector<2x16x128xf32>
    %26 = arith.maximumf %21, %25 : vector<2x16x128xf32>
    %cst_14 = arith.constant 0.000000e+00 : f32
    %27 = vector.shape_cast %24 : vector<1x16x1xi1> to vector<1x16x1xi1>
    %28 = vector.broadcast %27 : vector<1x16x1xi1> to vector<2x16x128xi1>
    %29 = vector.broadcast %cst_14 : f32 to vector<2x16x128xf32>
    %30 = arith.select %28, %26, %29 : vector<2x16x128xi1>, vector<2x16x128xf32>
    %cst_15 = arith.constant dense<0xFF800000> : vector<2x128xf32>
    %31 = vector.multi_reduction <maximumf>, %30, %cst_15 [1] : vector<2x16x128xf32> to vector<2x128xf32>
    %32 = arith.truncf %31 : vector<2x128xf32> to vector<2x128xbf16>
    %cst_16 = arith.constant dense<0.000000e+00> : vector<2x128xf32>
    %33 = tpu.matmul %32, %5, %cst_16 {dimension_numbers = #tpu.dot_dimension_numbers<[1], [0], [0], [1], [0, 0, 1, 1], [], []>} : vector<2x128xbf16>, vector<128x128xbf16>, vector<2x128xf32> -> vector<2x128xf32>
    %34 = vector.broadcast %1 : vector<1x128xf32> to vector<2x128xf32>
    %35 = arith.addf %33, %34 : vector<2x128xf32>
    %cst_17 = arith.constant 0.000000e+00 : f32
    %36 = vector.broadcast %cst_17 : f32 to vector<2x128xf32>
    %37 = arith.maximumf %35, %36 : vector<2x128xf32>
    %38 = arith.truncf %37 : vector<2x128xf32> to vector<2x128xbf16>
    %cst_18 = arith.constant dense<0.000000e+00> : vector<2x128xf32>
    %39 = tpu.matmul %38, %6, %cst_18 {dimension_numbers = #tpu.dot_dimension_numbers<[1], [0], [0], [1], [0, 0, 1, 1], [], []>} : vector<2x128xbf16>, vector<128x128xbf16>, vector<2x128xf32> -> vector<2x128xf32>
    %40 = vector.broadcast %2 : vector<1x128xf32> to vector<2x128xf32>
    %41 = arith.addf %39, %40 : vector<2x128xf32>
    %cst_19 = arith.constant 0.000000e+00 : f32
    %42 = vector.broadcast %cst_19 : f32 to vector<2x128xf32>
    %43 = arith.maximumf %41, %42 : vector<2x128xf32>
    %44 = arith.truncf %43 : vector<2x128xf32> to vector<2x128xbf16>
    %cst_20 = arith.constant dense<0.000000e+00> : vector<2x128xf32>
    %45 = tpu.matmul %44, %7, %cst_20 {dimension_numbers = #tpu.dot_dimension_numbers<[1], [0], [0], [1], [0, 0, 1, 1], [], []>} : vector<2x128xbf16>, vector<128x128xbf16>, vector<2x128xf32> -> vector<2x128xf32>
    %46 = vector.broadcast %3 : vector<1x128xf32> to vector<2x128xf32>
    %47 = arith.addf %45, %46 : vector<2x128xf32>
    %c0_21 = arith.constant 0 : index
    %c0_22 = arith.constant 0 : index
    %48 = vector.load %arg3[%c0_21, %c0_22] : memref<2x128xf32, #tpu.memory_space<vmem>>, vector<2x128xf32>
    tpu.vector_store %arg3[%c0_21, %c0_22], %47 {strides = array<i32>} : memref<2x128xf32, #tpu.memory_space<vmem>>, vector<2x128xf32>,
    return
  }
}

</mosaic_0001>

<bundles_post_ra>
// kernel: kimnet_apply.1
= control target key start
LH: loop header
LB: loop body
LE: loop exit
PB: predicated region body
PF: predicated region fallthrough
CT: control target
= control target key end

     0   :  { %8 = vsyncpa [#allocation3], 0  ;;  %s784_s12 = smov [#allocation2]   ;;  %s900_s0 = inlined_call_operand.vmem [shape: bf16[32,16], index: 0, kind: input, shape index: {}]   ;;  %s901_s1 = inlined_call_operand.hbm [shape: bf16[432,128], index: 1, kind: input, shape index: {}]   ;;  %s902_s2 = inlined_call_operand.vmem [shape: f32[4,128], index: 2, kind: input, shape index: {}]   ;;  %s903_s3 = inlined_call_operand.vmem [shape: f32[2,128], index: 3, kind: output, shape index: {}]  }
   0x1   :  { %s16_s13 = sshll.u32 %s784_s12, 4  ;;  %s760_s16 = scalar_lea.hbm %s901_s1, 3456  ;;  %s17_s13 = int_to_ptr.vmem [resolvable:$true] %s16_s13 }
   0x2   :  { %p761_p0 = scmp.ne.s32.totalorder %s901_s1, %s760_s16  ;;  %p764_p1 = scmp.lt.u32.totalorder %s760_s16, %s901_s1 }
   0x4   :  { %p766_p2 = pnand %p764_p1, %p761_p0 }
   0x6   :  { %769 = shalt.err (!%p766_p2)
}
   0x7   :  { %s770_s21 = scalar_lea.vmem %s17_s13, 3456  ;;  %p775_p4 = scmp.lt.s32.totalorder %s17_s13, %s17_s13 }
   0x8   :  { %p771_p3 = scmp.ne.s32.totalorder %s17_s13, %s770_s21  ;;  %p776_p5 = scmp.lt.s32.totalorder %s770_s21, %s770_s21 }
   0xa   :  { %p777_p6 = por %p776_p5, %p775_p4 }
   0xc   :  { %p778_p7 = pnand %p777_p6, %p771_p3 }
   0xe   :  { %781 = shalt.err (!%p778_p7)
}
   0xf   :  { %s785_s22 = smov 64   ;;  %s786_s23 = smov 4  }
  0x10   :  { %22 = dma.hbm_to_vmem [thread:$0]  %s901_s1, 3456, %s17_s13, [#allocation3], %s785_s22, %s785_s22, %s786_s23  }
  0x11   :  { %782 = dma.done.wait [#allocation3], 3456  }
  0x12   :  { %783 = vsyncadd [#allocation3], 4294963840  ;;  %v596_v0 = vld [vmem:[%s900_s0] sm:$0xff]   ;;  %v603_v1 = vld [vmem:[%s900_s0 + $0x8] sm:$0xff]   ;;  %vm99_vm0 = vcmask 1046528   ;;  %vm109_vm1 = vcmask 1045504  }
  0x13   :  { %v597_v2 = vunpack.c.l.bf16 %v596_v0  ;;  %v598_v3 = vunpack.c.h.bf16 %v596_v0  ;;  %v829_v4 = vunpack.c.l.bf16 %v603_v1  ;;  %v831_v5 = vunpack.c.h.bf16 %v603_v1  ;;  %v733_v6 = vld [vmem:[#allocation2] sm:$0xff]   ;;  %v734_v7 = vld [vmem:[#allocation2 + $0x8] sm:$0xff]   ;;  %v735_v16 = vld [vmem:[#allocation2 + $0x10] sm:$0xff]   ;;  %s788_s0 = smov 16   ;;  %s789_s1 = smov 32  }
  0x14   :  { %636 = vmatprep.subr.bf16.mxu0 %v733_v6  ;;  %v736_v19 = vld [vmem:[#allocation2 + $0x18] sm:$0xff]   ;;  %v787_v24 = vmov 0.0   ;;  %vm145_vm2 = vcmask 130048   ;;  %vm150_vm3 = vcmask 261120   ;;  %vm179_vm4 = vcmask 392192   ;;  %v737_v53 = vld [vmem:[#allocation2 + $0x20] sm:$0xff]  }
  0x15   :  { %v100_v8 = vrot.slane %v597_v2, 1  ;;  %v101_v9 = vrot.slane %v598_v3, 1  ;;  %v103_v10 = vrot.slane %v829_v4, 1  ;;  %v110_v11 = vrot.slane %v597_v2, 2  ;;  %637 = vmatpush3.bf16.msra.mxu0 %v733_v6  ;;  %646 = vmatprep.subr.bf16.mxu1 %v787_v24  ;;  %v738_v54 = vld [vmem:[#allocation2 + $0x28] sm:$0xff]   ;;  %v739_v55 = vld [vmem:[#allocation2 + $0x30] sm:$0xff]  }
  0x16   :  { %v111_v12 = vrot.slane %v598_v3, 2  ;;  %v113_v13 = vrot.slane %v829_v4, 2  ;;  %v105_v14 = vrot.slane %v831_v5, 1  ;;  %v115_v15 = vrot.slane %v831_v5, 2  ;;  %638 = vmatprep.subr.bf16.mxu0 %v734_v7  ;;  %647 = vmatpush3.bf16.msra.mxu1 %v736_v19  ;;  %v740_v56 = vld [vmem:[#allocation2 + $0x38] sm:$0xff]   ;;  %v741_v57 = vld [vmem:[#allocation2 + $0x40] sm:$0xff]  }
  0x17   :  { %v102_v17 = vsel %vm99_vm0, %v100_v8, %v101_v9  ;;  %v104_v18 = vsel %vm99_vm0, %v101_v9, %v103_v10  ;;  %648 = vmatprep.subr.bf16.mxu1 %v787_v24  ;;  %v742_v58 = vld [vmem:[#allocation2 + $0x48] sm:$0xff]   ;;  %vm790_vm5 = vmmov 0   ;;  %v743_v59 = vld [vmem:[#allocation2 + $0x50] sm:$0xff]   ;;  %v744_v60 = vld [vmem:[#allocation2 + $0x58] sm:$0xff]   ;;  %vm276_vm7 = vcmask 1041409  }
  0x18   :  { %v713_v20 = vpack.i.bf16 %v104_v18, %v102_v17  ;;  %v112_v21 = vsel %vm109_vm1, %v110_v11, %v111_v12  ;;  %v114_v22 = vsel %vm109_vm1, %v111_v12, %v113_v13  ;;  %v106_v23 = vsel %vm99_vm0, %v103_v10, %v105_v14  ;;  %662 = vmatprep.mubr.msk.bf16.mxu1 %vm790_vm5, %v787_v24  ;;  %v745_v61 = vld [vmem:[#allocation2 + $0x60] sm:$0xff]   ;;  %v746_v62 = vld [vmem:[#allocation2 + $0x68] sm:$0xff]   ;;  %v747_v63 = vld [vmem:[#allocation2 + $0x70] sm:$0xff]  }
  0x19   :  { %v723_v25 = vpack.i.bf16 %v114_v22, %v112_v21  ;;  %v108_v26 = vsel %vm99_vm0, %v105_v14, 0.0  ;;  %v116_v27 = vsel %vm109_vm1, %v113_v13, %v115_v15  ;;  %v118_v28 = vsel %vm109_vm1, %v115_v15, 0.0  ;;  %639 = vmatpush3.bf16.msra.mxu0 %v734_v7  ;;  %v748_v0 = vld [vmem:[#allocation2 + $0x78] sm:$0xff]   ;;  %v749_v1 = vld [vmem:[#allocation2 + $0x80] sm:$0xff]  }
  0x1a   :  { %714 = vrot.lane.b32.xlu0 %v713_v20, %s788_s0  ;;  %v718_v29 = vpack.i.bf16 %v108_v26, %v106_v23  ;;  %v728_v30 = vpack.i.bf16 %v118_v28, %v116_v27  ;;  %640 = vmatprep.subr.bf16.mxu0 %v735_v16 }
  0x1b   :  { %724 = vrot.lane.b32.xlu1 %v723_v25, %s789_s1  ;;  %649 = vmatpush3.bf16.msra.mxu1 %v737_v53 }
  0x1c   :  { %650 = vmatprep.subr.bf16.mxu1 %v787_v24 }
  0x1d   :  { %641 = vmatpush3.bf16.msra.mxu0 %v735_v16 }
  0x1e   :  { %719 = vrot.lane.b32.xlu0 %v718_v29, %s788_s0  ;;  %666 = vmatprep.subr.bf16.mxu0 %v787_v24 }
  0x1f   :  { %729 = vrot.lane.b32.xlu1 %v728_v30, %s789_s1  ;;  %651 = vmatpush3.bf16.msra.mxu1 %v738_v54 }
  0x20   :  { %652 = vmatprep.subr.bf16.mxu1 %v787_v24 }
  0x23   :  { %653 = vmatpush3.bf16.msra.mxu1 %v739_v55 }
  0x24   :  { %654 = vmatprep.subr.bf16.mxu1 %v787_v24 }
  0x27   :  { %655 = vmatpush3.bf16.msra.mxu1 %v740_v56 }
  0x28   :  { %656 = vmatprep.subr.bf16.mxu1 %v787_v24 }
  0x2b   :  { %657 = vmatpush3.bf16.msra.mxu1 %v741_v57  ;;  %v758_v57 = vld [vmem:[#allocation2 + $0xc8] sm:$0xff]  }
  0x2c   :  { %658 = vmatprep.subr.bf16.mxu1 %v787_v24 }
  0x2f   :  { %659 = vmatpush3.bf16.msra.mxu1 %v742_v58  ;;  %v759_v58 = vld [vmem:[#allocation2 + $0xd0] sm:$0xff]  }
  0x30   :  { %660 = vmatprep.subr.bf16.mxu1 %v787_v24 }
  0x33   :  { %661 = vmatpush3.bf16.msra.mxu1 %v743_v59  ;;  %v577_v59 = vld [vmem:[%s902_s2 + $0x2] ss:$0 sm:$0xff] }
  0x34   :  { %686 = vmatprep.subr.bf16.mxu1 %v787_v24 }
  0x8c   :  { %v715_v31 = vpop.permute.xlu0 %714 }
  0x8d   :  { %v717_v32 = vunpack.i.h.bf16 %v715_v31  ;;  %v716_v33 = vunpack.i.l.bf16 %v715_v31  ;;  %v725_v34 = vpop.permute.xlu1 %724 }
  0x8e   :  { %v727_v35 = vunpack.i.h.bf16 %v725_v34  ;;  %v726_v36 = vunpack.i.l.bf16 %v725_v34 }
  0x8f   :  { %v146_v37 = vsel %vm145_vm2, %v597_v2, %v716_v33  ;;  %v147_v38 = vsel %vm145_vm2, %v598_v3, %v717_v32  ;;  %v235_v2 = vlaneseq }
  0x90   :  { %v720_v39 = vpop.permute.xlu0 %719  ;;  %v151_v40 = vsel %vm150_vm3, %v146_v37, %v726_v36  ;;  %v152_v41 = vsel %vm150_vm3, %v147_v38, %v727_v35 }
  0x91   :  { %v722_v42 = vunpack.i.h.bf16 %v720_v39  ;;  %v721_v43 = vunpack.i.l.bf16 %v720_v39  ;;  %v730_v44 = vpop.permute.xlu1 %729  ;;  %v155_v45 = vpack.c.bf16 %v152_v41, %v151_v40  ;;  %v236_v3 = vshrl.u32 %v235_v2, 7  ;;  %v750_v41 = vld [vmem:[#allocation2 + $0x88] sm:$0xff]  }
  0x92   :  { %v732_v46 = vunpack.i.h.bf16 %v730_v44  ;;  %v731_v47 = vunpack.i.l.bf16 %v730_v44  ;;  %v753_v44 = vld [vmem:[#allocation2 + $0xa0] sm:$0xff]  }
  0x93   :  { %v149_v48 = vsel %vm145_vm2, %v831_v5, %v722_v42  ;;  %v148_v49 = vsel %vm145_vm2, %v829_v4, %v721_v43  ;;  %642 = vmatprep.mubr.msk.bf16.mxu0 %vm179_vm4, %v155_v45  ;;  %v562_v4 = vld [vmem:[%s902_s2] ss:$0 sm:$0xff]  ;;  %v237_v6 = vadd.s32 8, %v236_v3  ;;  %v751_v42 = vld [vmem:[#allocation2 + $0x90] sm:$0xff]   ;;  %v752_v43 = vld [vmem:[#allocation2 + $0x98] sm:$0xff]  }
  0x94   :  { %v153_v50 = vsel %vm150_vm3, %v148_v49, %v731_v47  ;;  %v154_v51 = vsel %vm150_vm3, %v149_v48, %v732_v46  ;;  %v754_v45 = vld [vmem:[#allocation2 + $0xa8] sm:$0xff]   ;;  %v755_v46 = vld [vmem:[#allocation2 + $0xb0] sm:$0xff]   ;;  %v756_v47 = vld [vmem:[#allocation2 + $0xb8] sm:$0xff]  }
  0x95   :  { %v156_v52 = vpack.c.bf16 %v154_v51, %v153_v50  ;;  %vm239_vm6 = vcmp.lt.s32.totalorder %v237_v6, 14  ;;  %v757_v48 = vld [vmem:[#allocation2 + $0xc0] sm:$0xff]  }
  0x96   :  { %v568_v49 = vld [vmem:[%s902_s2 + $0x1] ss:$0 sm:$0xff]  ;;  %v586_v3 = vld [vmem:[%s902_s2 + $0x3] ss:$0 sm:$0xff] }
  0x97   :  { %643 = vmatmul.mubr.msk.bf16.vlgmr.msra.gmra.mrb[0].mxu0 %vm179_vm4, %v156_v52 }
  0x98   :  { %682 = vmatprep.mubr.msk.bf16.mxu0 %vm790_vm5, %v787_v24  ;;  %667 = vmatpush3.bf16.msra.mxu0 %v744_v60 }
  0x99   :  { %668 = vmatprep.subr.bf16.mxu0 %v787_v24 }
  0x9c   :  { %669 = vmatpush3.bf16.msra.mxu0 %v745_v61 }
  0x9d   :  { %670 = vmatprep.subr.bf16.mxu0 %v787_v24 }
  0xa0   :  { %671 = vmatpush3.bf16.msra.mxu0 %v746_v62 }
  0xa1   :  { %672 = vmatprep.subr.bf16.mxu0 %v787_v24 }
  0xa4   :  { %673 = vmatpush3.bf16.msra.mxu0 %v747_v63 }
  0xa5   :  { %674 = vmatprep.subr.bf16.mxu0 %v787_v24 }
  0xa8   :  { %675 = vmatpush3.bf16.msra.mxu0 %v748_v0 }
  0xa9   :  { %676 = vmatprep.subr.bf16.mxu0 %v787_v24 }
  0xac   :  { %677 = vmatpush3.bf16.msra.mxu0 %v749_v1 }
  0xad   :  { %678 = vmatprep.subr.bf16.mxu0 %v787_v24 }
  0xb0   :  { %679 = vmatpush3.bf16.msra.mxu0 %v750_v41 }
  0xb1   :  { %680 = vmatprep.subr.bf16.mxu0 %v787_v24 }
  0xb4   :  { %681 = vmatpush3.bf16.msra.mxu0 %v751_v42 }
 0x16a   :  { %v644_v5 = vpop.f32.mrb[0].mxu0 }
 0x16b   :  { %v220_v7 = vpop.f32.mrb[1].mxu0  ;;  %v229_v8 = vadd.f32 %v644_v5, %v562_v4 }
 0x16c   :  { %v645_v9 = vpop.f32.mrb[2].mxu0  ;;  %v221_v10 = vadd.f32 %v562_v4, %v220_v7 }
 0x16d   :  { %v232_v11 = vadd.f32 %v645_v9, %v562_v4  ;;  %v223_v12 = vpop.f32.mrb[3].mxu0  ;;  %v242_v15 = vmax.f32 %v229_v8, 0.0 }
 0x16e   :  { %v224_v13 = vadd.f32 %v562_v4, %v223_v12  ;;  %v240_v17 = vmax.f32 %v221_v10, 0.0 }
 0x16f   :  { %v243_v14 = vmax.f32 %v232_v11, 0.0 }
 0x170   :  { %v241_v16 = vmax.f32 %v224_v13, 0.0 }
 0x171   :  { %v251_v18 = vsel %vm239_vm6, %v243_v14, 0.0 }
 0x172   :  { %v259_v19 = vmax.f32 %v242_v15, %v251_v18  ;;  %v249_v20 = vsel %vm239_vm6, %v241_v16, 0.0 }
 0x173   :  { %v252_v21 = vmax.f32 %v240_v17, %v249_v20 }
 0x174   :  { %v260_v22 = vrot.slane %v259_v19, 4 }
 0x175   :  { %v253_v23 = vrot.slane %v252_v21, 4 }
 0x176   :  { %v261_v25 = vmax.f32 %v259_v19, %v260_v22 }
 0x177   :  { %v254_v26 = vmax.f32 %v252_v21, %v253_v23 }
 0x178   :  { %v262_v27 = vrot.slane %v261_v25, 2 }
 0x179   :  { %v255_v28 = vrot.slane %v254_v26, 2 }
 0x17a   :  { %v263_v29 = vmax.f32 %v261_v25, %v262_v27 }
 0x17b   :  { %v256_v30 = vmax.f32 %v254_v26, %v255_v28 }
 0x17c   :  { %v264_v31 = vrot.slane %v263_v29, 1 }
 0x17d   :  { %v257_v32 = vrot.slane %v256_v30, 1 }
 0x17e   :  { %v265_v33 = vmax.f32 %v263_v29, %v264_v31 }
 0x17f   :  { %v258_v34 = vmax.f32 %v256_v30, %v257_v32 }
 0x180   :  { %v267_v35 = vpack.c.bf16 %v265_v33, %v265_v33 }
 0x181   :  { %v266_v36 = vpack.c.bf16 %v258_v34, %v258_v34 }
 0x182   :  { %v275_v37 = vunpack.c.l.b16 %v267_v35 }
 0x183   :  { %v274_v38 = vunpack.c.l.b16 %v266_v36 }
 0x185   :  { %v277_v39 = vsel %vm276_vm7, %v275_v37, %v274_v38 }
 0x186   :  { %v278_v40 = vpack.c.b16 %v277_v39, %v277_v39 }
 0x188   :  { %663 = vmatmul.mubr.bf16.vlgmr.msra.gmra.mrb[0].mxu1 %v278_v40 }
 0x189   :  { %702 = vmatprep.mubr.msk.bf16.mxu1 %vm790_vm5, %v787_v24  ;;  %687 = vmatpush3.bf16.msra.mxu1 %v752_v43 }
 0x18a   :  { %688 = vmatprep.subr.bf16.mxu1 %v787_v24 }
 0x18d   :  { %689 = vmatpush3.bf16.msra.mxu1 %v753_v44 }
 0x18e   :  { %690 = vmatprep.subr.bf16.mxu1 %v787_v24 }
 0x191   :  { %691 = vmatpush3.bf16.msra.mxu1 %v754_v45 }
 0x192   :  { %692 = vmatprep.subr.bf16.mxu1 %v787_v24 }
 0x195   :  { %693 = vmatpush3.bf16.msra.mxu1 %v755_v46 }
 0x196   :  { %694 = vmatprep.subr.bf16.mxu1 %v787_v24 }
 0x199   :  { %695 = vmatpush3.bf16.msra.mxu1 %v756_v47 }
 0x19a   :  { %696 = vmatprep.subr.bf16.mxu1 %v787_v24 }
 0x19d   :  { %697 = vmatpush3.bf16.msra.mxu1 %v757_v48 }
 0x19e   :  { %698 = vmatprep.subr.bf16.mxu1 %v787_v24 }
 0x1a1   :  { %699 = vmatpush3.bf16.msra.mxu1 %v758_v57 }
 0x1a2   :  { %700 = vmatprep.subr.bf16.mxu1 %v787_v24 }
 0x1a5   :  { %701 = vmatpush3.bf16.msra.mxu1 %v759_v58 }
 0x25b   :  { %v362_v50 = vpop.f32.mrb[0].mxu1 }
 0x25c   :  { %v363_v51 = vadd.f32 %v568_v49, %v362_v50  ;;  %v664_v52 = vpop.f32.mrb[1].mxu1 }
 0x25d   :  { %v365_v53 = vpop.f32.mrb[2].mxu1 }
 0x25e   :  { %v368_v54 = vmax.f32 %v363_v51, 0.0  ;;  %v665_v55 = vpop.f32.mrb[3].mxu1 }
 0x260   :  { %v369_v56 = vpack.c.bf16 %v368_v54, %v368_v54 }
 0x262   :  { %683 = vmatmul.mubr.bf16.vlgmr.msra.gmra.mrb[4].mxu0 %v369_v56 }
 0x335   :  { %v456_v60 = vpop.f32.mrb[4].mxu0 }
 0x336   :  { %v457_v61 = vadd.f32 %v577_v59, %v456_v60  ;;  %v684_v62 = vpop.f32.mrb[5].mxu0 }
 0x337   :  { %v459_v63 = vpop.f32.mrb[6].mxu0 }
 0x338   :  { %v462_v0 = vmax.f32 %v457_v61, 0.0  ;;  %v685_v1 = vpop.f32.mrb[7].mxu0 }
 0x33a   :  { %v463_v2 = vpack.c.bf16 %v462_v0, %v462_v0 }
 0x33c   :  { %703 = vmatmul.mubr.bf16.vlgmr.msra.gmra.mrb[4].mxu1 %v463_v2 }
 0x40f   :  { %v550_v4 = vpop.f32.mrb[4].mxu1 }
 0x410   :  { %v551_v24 = vadd.f32 %v586_v3, %v550_v4  ;;  %v704_v5 = vpop.f32.mrb[5].mxu1 }
 0x411   :  { %v553_v6 = vpop.f32.mrb[6].mxu1 }
 0x412   :  { %556 = vst [vmem:[%s903_s3] sm:$0x3] %v551_v24  ;;  %v705_v7 = vpop.f32.mrb[7].mxu1 }
 0x413   :  { %561 = vsyncpa [#allocation3], 1 }

</bundles_post_ra>
